<compile_context>
chip_gen: v5e
topology: v5e:2x2
jax: 0.10.0
libtpu: 0.0.40
codegen_flags: <defaults>
</compile_context>

<pallas_src>
import functools
import math

import jax
import jax.numpy as jnp
from jax.experimental import pallas as pl
from jax.experimental.pallas import tpu as pltpu


# --------------------------------------------------------------------------------
# Kernel
# --------------------------------------------------------------------------------
def _online_softmax_tile(q3, k_t, v_t, keep, m_scr, l_scr, acc_scr, mm_dtype):
    """One KV tile of head-batched online-softmax attention.

    q3  : (H, tq, d_k)   k_t/v_t : (H, tk, d_k)   keep : (1, tq, tk) bool or None
    """
    s = jnp.einsum('hqd,hkd->hqk', q3, k_t,
                   preferred_element_type=jnp.float32)            # (H, tq, tk)
    if keep is not None:
        # masked_fill(mask == 0, -8192) semantics of the reference module.
        s = jnp.where(keep, s, jnp.float32(-8192.0))

    m_prev = m_scr[...]                                            # (H, tq, 1)
    m_new = jnp.maximum(m_prev, jnp.max(s, axis=-1, keepdims=True))
    alpha = jnp.exp(m_prev - m_new)
    p = jnp.exp(s - m_new)
    l_scr[...] = alpha * l_scr[...] + jnp.sum(p, axis=-1, keepdims=True)
    acc_scr[...] = alpha * acc_scr[...] + jnp.einsum(
        'hqk,hkd->hqd', p.astype(mm_dtype), v_t,
        preferred_element_type=jnp.float32)
    m_scr[...] = m_new


def _flash_mha_kernel(*refs, num_heads, d_k, d_model, q_tile, kv_tile,
                      seq_len, causal, has_mask):
    """One grid step = one (batch element, query tile)."""
    if has_mask:
        (q_ref, k_ref, v_ref, mask_ref, wo_ref, bo_ref, o_ref,
         m_scr, l_scr, acc_scr) = refs
    else:
        (q_ref, k_ref, v_ref, wo_ref, bo_ref, o_ref,
         m_scr, l_scr, acc_scr) = refs
        mask_ref = None

    qi = pl.program_id(1)
    mm_dtype = k_ref.dtype                      # MXU operand dtype (bf16 or f32)

    # Fresh accumulators for every (batch, q-tile) grid step (both axes parallel).
    m_scr[...] = jnp.full_like(m_scr, -jnp.inf)
    l_scr[...] = jnp.zeros_like(l_scr)
    acc_scr[...] = jnp.zeros_like(acc_scr)

    q3 = q_ref[0]                               # (H, tq, d_k); 1/sqrt(d_k) folded in

    if has_mask:
        # General (data-dependent) mask: static unroll over KV tiles so the int8
        # mask strip is sliced with static lane offsets only.
        for kt in range(seq_len // kv_tile):
            ks = kt * kv_tile
            k_t = k_ref[0, :, ks:ks + kv_tile, :]                 # (H, tk, d_k)
            v_t = v_ref[0, :, ks:ks + kv_tile, :]
            keep = (mask_ref[0, 0, :, ks:ks + kv_tile] != 0)[None, :, :]
            _online_softmax_tile(q3, k_t, v_t, keep,
                                 m_scr, l_scr, acc_scr, mm_dtype)
    else:
        # Causal (or unmasked): dynamic KV loop.  The causal path skips KV tiles
        # beyond the diagonal entirely and builds the in-tile bias from iota
        # (zero mask DMA).
        if causal:
            n_kv = pl.cdiv((qi + 1) * q_tile, kv_tile)
        else:
            n_kv = seq_len // kv_tile

        def kv_step(kt, carry):
            ks = pl.multiple_of(kt * kv_tile, kv_tile)
            k_t = k_ref[0, :, pl.ds(ks, kv_tile), :]              # (H, tk, d_k)
            v_t = v_ref[0, :, pl.ds(ks, kv_tile), :]
            if causal:
                q_pos = (jax.lax.broadcasted_iota(jnp.int32, (q_tile, kv_tile), 0)
                         + qi * q_tile)
                k_pos = (jax.lax.broadcasted_iota(jnp.int32, (q_tile, kv_tile), 1)
                         + ks)
                keep = (q_pos >= k_pos)[None, :, :]
            else:
                keep = None
            _online_softmax_tile(q3, k_t, v_t, keep,
                                 m_scr, l_scr, acc_scr, mm_dtype)
            return carry

        jax.lax.fori_loop(0, n_kv, kv_step, 0)

    # Epilogue: normalize (EUP reciprocal) and fused output projection.  Wo is
    # sliced on its sublane axis per head; the (tq, D) store is lane-dense.
    ctx = acc_scr[...] * pl.reciprocal(l_scr[...], approx=True)    # (H, tq, d_k) f32
    out = jnp.zeros((q_tile, d_model), jnp.float32)
    for h in range(num_heads):
        out = out + jnp.dot(ctx[h].astype(mm_dtype),
                            wo_ref[h * d_k:(h + 1) * d_k, :],
                            preferred_element_type=jnp.float32)
    o_ref[0] = (out + bo_ref[...]).astype(o_ref.dtype)


# --------------------------------------------------------------------------------
# Wrapper
# --------------------------------------------------------------------------------
def _pick_tile(n, max_tile):
    """Largest multiple-of-8 divisor of n that is <= max_tile (full extent if n fits).

    Never silently degrades to an (S, S)-sized tile when S > max_tile unless S has
    no aligned divisor at all (degenerate, e.g. prime S)."""
    if n <= max_tile:
        return n
    best = None
    for t in range(8, max_tile + 1, 8):
        if n % t == 0:
            best = t
    return best if best is not None else n


def _default_tiles():
    """Generation-aware default q/kv tile sizes (256-wide MXU on v6e/v7x)."""
    try:
        kind = jax.devices()[0].device_kind.lower()
    except Exception:
        kind = ""
    if "v5 lite" in kind or "v5e" in kind:
        return 128, 256
    return 256, 256


def _vmem_limit_bytes(estimate):
    """Clamp the scoped VMEM limit to the chip's physical per-core capacity."""
    try:
        cap = int(pltpu.get_tpu_info().vmem_capacity_bytes)
    except Exception:
        cap = 64 * 1024 * 1024          # conservative: v7x per-TensorCore VMEM
    headroom = 8 * 1024 * 1024
    want = max(2 * estimate, 32 * 1024 * 1024)
    return int(max(min(want, cap - headroom), 4 * 1024 * 1024))


def multi_headed_attention(query, key, value, mask=None, params=None, *,
                           num_heads, causal=False,
                           compute_dtype=jnp.bfloat16,
                           q_tile=None, kv_tile=None):
    """Pallas forward of MultiHeadedAttention (dropout = identity)."""
    B, S, D = query.shape
    assert D % num_heads == 0, "d_model must be divisible by num_heads"
    d_k = D // num_heads
    wq, bq, wk, bk, wv, bv, wo, bo = params
    if causal and mask is not None:
        raise ValueError("pass either causal=True or an explicit mask, not both")

    cdt = jnp.dtype(compute_dtype)
    inv_sqrt_dk = 1.0 / math.sqrt(d_k)

    dq_tile, dkv_tile = _default_tiles()
    tq = _pick_tile(S, q_tile if q_tile is not None else dq_tile)
    tk = _pick_tile(S, kv_tile if kv_tile is not None else dkv_tile)

    # ---- input projections: plain XLA GEMMs (bf16 operands, f32 accumulation),
    # ---- head split done wrapper-side so the kernel sees (B, H, S, d_k).
    def project(x, w, b, scale=None):
        y = jnp.dot(x.astype(cdt), w.astype(cdt),
                    preferred_element_type=jnp.float32) + b[0].astype(jnp.float32)
        if scale is not None:
            y = y * scale
        return y.reshape(B, S, num_heads, d_k).transpose(0, 2, 1, 3).astype(cdt)

    q_heads = project(query, wq, bq, scale=inv_sqrt_dk)   # scale folded into Q
    k_heads = project(key, wk, bk)
    v_heads = project(value, wv, bv)
    wo_c = wo.astype(cdt)
    bo_c = bo.astype(jnp.float32)

    has_mask = mask is not None
    if has_mask:
        mask_i8 = (jnp.broadcast_to(mask, (B, 1, S, S)) != 0).astype(jnp.int8)

    grid = (B, S // tq)

    q_spec = pl.BlockSpec((1, num_heads, tq, d_k), lambda b, i: (b, 0, i, 0))
    kv_spec = pl.BlockSpec((1, num_heads, S, d_k), lambda b, i: (b, 0, 0, 0))
    wo_spec = pl.BlockSpec((D, D), lambda b, i: (0, 0))
    bo_spec = pl.BlockSpec((1, D), lambda b, i: (0, 0))
    out_spec = pl.BlockSpec((1, tq, D), lambda b, i: (b, i, 0))

    in_specs = [q_spec, kv_spec, kv_spec]
    inputs = [q_heads, k_heads, v_heads]
    if has_mask:
        in_specs.append(pl.BlockSpec((1, 1, tq, S), lambda b, i: (b, 0, i, 0)))
        inputs.append(mask_i8)
    in_specs += [wo_spec, bo_spec]
    inputs += [wo_c, bo_c]

    scratch_shapes = [
        pltpu.VMEM((num_heads, tq, 1), jnp.float32),    # running max
        pltpu.VMEM((num_heads, tq, 1), jnp.float32),    # running denom
        pltpu.VMEM((num_heads, tq, d_k), jnp.float32),  # running context
    ]

    # ---- rough VMEM estimate (with (8, 128) tile padding), clamped to the chip ----
    def _pad(x, m):
        return -(-x // m) * m

    isz = cdt.itemsize
    dk_l = _pad(d_k, 128)
    blk = (num_heads * _pad(tq, 8) * dk_l * isz            # Q tile
           + 2 * num_heads * _pad(S, 8) * dk_l * isz       # projected K and V
           + _pad(D, 8) * _pad(D, 128) * isz               # Wo
           + 8 * _pad(D, 128) * 4                          # bo (f32)
           + _pad(tq, 8) * _pad(D, 128) * query.dtype.itemsize)   # output tile
    if has_mask:
        blk += _pad(tq, 8) * _pad(S, 128) * 1              # int8 mask strip
    scratch_bytes = num_heads * _pad(tq, 8) * (2 * 128 + dk_l) * 4
    vmem_estimate = 2 * blk + scratch_bytes                # pipeline double-buffers

    kernel = functools.partial(
        _flash_mha_kernel, num_heads=num_heads, d_k=d_k, d_model=D,
        q_tile=tq, kv_tile=tk, seq_len=S, causal=causal, has_mask=has_mask)

    return pl.pallas_call(
        kernel,
        out_shape=jax.ShapeDtypeStruct((B, S, D), query.dtype),
        grid_spec=pltpu.PrefetchScalarGridSpec(
            num_scalar_prefetch=0,
            grid=grid,
            in_specs=in_specs,
            out_specs=out_spec,
            scratch_shapes=scratch_shapes,
        ),
        compiler_params=pltpu.CompilerParams(
            # no cross-step state -> both the batch and query-tile axes are
            # independent (uses both TensorCores even when B == 1).
            dimension_semantics=("parallel", "parallel"),
            vmem_limit_bytes=_vmem_limit_bytes(vmem_estimate),
        ),
    )(*inputs)


# --------------------------------------------------------------------------------
# Reference + test harness
# --------------------------------------------------------------------------------
def reference_mha(query, key, value, mask, params, *, num_heads):
    """Plain-JAX f32 reference mirroring the PyTorch forward (dropout = identity)."""
    B, S, D = query.shape
    d_k = D // num_heads
    wq, bq, wk, bk, wv, bv, wo, bo = params

    def proj(x, w, b):
        return (x @ w + b[0]).reshape(B, S, num_heads, d_k).transpose(0, 2, 1, 3)

    q = proj(query, wq, bq)
    k = proj(key, wk, bk)
    v = proj(value, wv, bv)
    scores = jnp.einsum('bhqd,bhkd->bhqk', q, k) / math.sqrt(d_k)
    if mask is not None:
        scores = jnp.where(mask == 0, -8192.0, scores)
    p = jax.nn.softmax(scores, axis=-1)
    x = jnp.einsum('bhqk,bhkd->bhqd', p, v)
    x = x.transpose(0, 2, 1, 3).reshape(B, S, D)
    return x @ wo + bo[0]


def _make_params(rng, d_model):
    bound = 1.0 / math.sqrt(d_model)
    keys = jax.random.split(rng, 8)

    def u(k, shape):
        return jax.random.uniform(k, shape, jnp.float32, -bound, bound)

    return (
        u(keys[0], (d_model, d_model)), u(keys[1], (1, d_model)),   # query linear
        u(keys[2], (d_model, d_model)), u(keys[3], (1, d_model)),   # key linear
        u(keys[4], (d_model, d_model)), u(keys[5], (1, d_model)),   # value linear
        u(keys[6], (d_model, d_model)), u(keys[7], (1, d_model)),   # output linear
    )


def _run_case(rng, *, B, S, D, H, causal, compute_dtype, q_tile, kv_tile,
              mask=None, atol, rtol, name):
    keys = jax.random.split(rng, 4)
    params = _make_params(keys[0], D)
    query = jax.random.normal(keys[1], (B, S, D), jnp.float32)
    key_in = jax.random.normal(keys[2], (B, S, D), jnp.float32)
    value = jax.random.normal(keys[3], (B, S, D), jnp.float32)

    out = multi_headed_attention(query, key_in, value, mask, params,
                                 num_heads=H, causal=causal,
                                 compute_dtype=compute_dtype,
                                 q_tile=q_tile, kv_tile=kv_tile)
    out = jax.block_until_ready(out)

    if causal:
        ref_mask = jnp.broadcast_to(
            jnp.tril(jnp.ones((S, S), jnp.int32))[None, None], (B, 1, S, S))
    else:
        ref_mask = mask
    ref = reference_mha(query, key_in, value, ref_mask, params, num_heads=H)

    assert out.shape == (B, S, D)
    err = jnp.max(jnp.abs(out.astype(jnp.float32) - ref))
    assert jnp.allclose(out.astype(jnp.float32), ref, atol=atol, rtol=rtol), \
        f"{name}: max abs err = {err}"


if __name__ == "__main__":
    root = jax.random.PRNGKey(0)
    k1, k2, k3 = jax.random.split(root, 3)

    # 1) Small shape, f32 compute path, causal bias generated in-kernel (no mask DMA).
    _run_case(k1, B=2, S=8, D=32, H=4, causal=True, compute_dtype=jnp.float32,
              q_tile=8, kv_tile=8, atol=5e-3, rtol=5e-3, name="small_causal_f32")

    # 2) Multi-tile causal, f32: grid (2, 2); dynamic KV loop skips tiles above the
    #    diagonal (flash / online-softmax path).
    _run_case(k2, B=2, S=256, D=128, H=4, causal=True, compute_dtype=jnp.float32,
              q_tile=128, kv_tile=64, atol=5e-3, rtol=5e-3, name="causal_f32_tiled")

    # 3) bf16 compute path + explicit padding mask (int8 mask DMA, static KV unroll).
    B, S = 2, 256
    valid = jnp.array([256, 160], jnp.int32)
    kpos = jnp.arange(S)[None, None, None, :]
    pad_mask = jnp.broadcast_to(
        (kpos < valid[:, None, None, None]).astype(jnp.int32), (B, 1, S, S))
    _run_case(k3, B=B, S=S, D=128, H=4, causal=False, compute_dtype=jnp.bfloat16,
              q_tile=128, kv_tile=128, mask=pad_mask, atol=5e-2, rtol=5e-2,
              name="masked_bf16")

    print("KERNEL_OK")
</pallas_src>

<mosaic_0001>
module attributes {stable_mosaic.version = 11 : i64} {
  func.func @_flash_mha_kernel(%arg0: i32, %arg1: i32, %arg2: memref<1x4x8x8xf32, #tpu.memory_space<vmem>>, %arg3: memref<1x4x8x8xf32, #tpu.memory_space<vmem>>, %arg4: memref<1x4x8x8xf32, #tpu.memory_space<vmem>>, %arg5: memref<32x32xf32, #tpu.memory_space<vmem>>, %arg6: memref<1x32xf32, #tpu.memory_space<vmem>>, %arg7: memref<1x8x32xf32, #tpu.memory_space<vmem>>, %arg8: memref<4x8x1xf32, #tpu.memory_space<vmem>>, %arg9: memref<4x8x1xf32, #tpu.memory_space<vmem>>, %arg10: memref<4x8x8xf32, #tpu.memory_space<vmem>>) attributes {dimension_semantics = [#tpu.dimension_semantics<parallel>, #tpu.dimension_semantics<parallel>], iteration_bounds = array<i64: 2, 1>, scalar_prefetch = 0 : i64, scratch_operands = 3 : i64, tpu.core_type = #tpu.core_type<tc>, window_params = [{transform_indices = @transform_0, window_bounds = array<i64: 1, 4, 8, 8>}, {transform_indices = @transform_1, window_bounds = array<i64: 1, 4, 8, 8>}, {transform_indices = @transform_2, window_bounds = array<i64: 1, 4, 8, 8>}, {pipeline_mode = #tpu.pipeline_mode<synchronous>, transform_indices = @transform_3, window_bounds = array<i64: 32, 32>}, {pipeline_mode = #tpu.pipeline_mode<synchronous>, transform_indices = @transform_4, window_bounds = array<i64: 1, 32>}, {transform_indices = @transform_5, window_bounds = array<i64: 1, 8, 32>}]} {
    %cst = arith.constant 0xFF800000 : f32
    %0 = vector.broadcast %cst : f32 to vector<4x8x1xf32>
    %c0 = arith.constant 0 : index
    %c0_0 = arith.constant 0 : index
    %c0_1 = arith.constant 0 : index
    %1 = vector.load %arg8[%c0, %c0_0, %c0_1] : memref<4x8x1xf32, #tpu.memory_space<vmem>>, vector<4x8x1xf32>
    tpu.vector_store %arg8[%c0, %c0_0, %c0_1], %0 {strides = array<i32>} : memref<4x8x1xf32, #tpu.memory_space<vmem>>, vector<4x8x1xf32>,
    %cst_2 = arith.constant 0.000000e+00 : f32
    %2 = vector.broadcast %cst_2 : f32 to vector<4x8x1xf32>
    %c0_3 = arith.constant 0 : index
    %c0_4 = arith.constant 0 : index
    %c0_5 = arith.constant 0 : index
    %3 = vector.load %arg9[%c0_3, %c0_4, %c0_5] : memref<4x8x1xf32, #tpu.memory_space<vmem>>, vector<4x8x1xf32>
    tpu.vector_store %arg9[%c0_3, %c0_4, %c0_5], %2 {strides = array<i32>} : memref<4x8x1xf32, #tpu.memory_space<vmem>>, vector<4x8x1xf32>,
    %cst_6 = arith.constant 0.000000e+00 : f32
    %4 = vector.broadcast %cst_6 : f32 to vector<4x8x8xf32>
    %c0_7 = arith.constant 0 : index
    %c0_8 = arith.constant 0 : index
    %c0_9 = arith.constant 0 : index
    %5 = vector.load %arg10[%c0_7, %c0_8, %c0_9] : memref<4x8x8xf32, #tpu.memory_space<vmem>>, vector<4x8x8xf32>
    tpu.vector_store %arg10[%c0_7, %c0_8, %c0_9], %4 {strides = array<i32>} : memref<4x8x8xf32, #tpu.memory_space<vmem>>, vector<4x8x8xf32>,
    %c0_10 = arith.constant 0 : index
    %c0_11 = arith.constant 0 : index
    %c0_12 = arith.constant 0 : index
    %c0_13 = arith.constant 0 : index
    %6 = vector.load %arg2[%c0_10, %c0_11, %c0_12, %c0_13] : memref<1x4x8x8xf32, #tpu.memory_space<vmem>>, vector<1x4x8x8xf32>
    %7 = vector.shape_cast %6 : vector<1x4x8x8xf32> to vector<4x8x8xf32>
    %c1_i32 = arith.constant 1 : i32
    %8 = arith.addi %arg1, %c1_i32 : i32
    %c8_i32 = arith.constant 8 : i32
    %9 = arith.muli %8, %c8_i32 : i32
    %c7_i32 = arith.constant 7 : i32
    %10 = arith.addi %9, %c7_i32 : i32
    %c8_i32_14 = arith.constant 8 : i32
    %11 = arith.divsi %10, %c8_i32_14 : i32
    %c0_i32 = arith.constant 0 : i32
    %c0_i32_15 = arith.constant 0 : i32
    %12 = arith.subi %11, %c0_i32_15 : i32
    %13 = arith.addi %c0_i32_15, %12 : i32
    %c1_i32_16 = arith.constant 1 : i32
    scf.for %arg11 = %c0_i32_15 to %13 step %c1_i32_16  : i32 {
      %c8_i32_38 = arith.constant 8 : i32
      %46 = arith.muli %arg11, %c8_i32_38 : i32
      %47 = tpu.assume_multiple %46, 8 : i32
      %c0_39 = arith.constant 0 : index
      %c0_40 = arith.constant 0 : index
      %48 = arith.index_cast %47 : i32 to index
      %c0_41 = arith.constant 0 : index
      %49 = vector.load %arg3[%c0_39, %c0_40, %48, %c0_41] : memref<1x4x8x8xf32, #tpu.memory_space<vmem>>, vector<1x4x8x8xf32>
      %50 = vector.shape_cast %49 : vector<1x4x8x8xf32> to vector<4x8x8xf32>
      %c0_42 = arith.constant 0 : index
      %c0_43 = arith.constant 0 : index
      %51 = arith.index_cast %47 : i32 to index
      %c0_44 = arith.constant 0 : index
      %52 = vector.load %arg4[%c0_42, %c0_43, %51, %c0_44] : memref<1x4x8x8xf32, #tpu.memory_space<vmem>>, vector<1x4x8x8xf32>
      %53 = vector.shape_cast %52 : vector<1x4x8x8xf32> to vector<4x8x8xf32>
      %54 = tpu.iota {dimensions = array<i32: 0>} : vector<8x8xi32>
      %c8_i32_45 = arith.constant 8 : i32
      %55 = arith.muli %arg1, %c8_i32_45 : i32
      %56 = vector.broadcast %55 : i32 to vector<8x8xi32>
      %57 = arith.addi %54, %56 : vector<8x8xi32>
      %58 = tpu.iota {dimensions = array<i32: 1>} : vector<8x8xi32>
      %59 = vector.broadcast %47 : i32 to vector<8x8xi32>
      %60 = arith.addi %58, %59 : vector<8x8xi32>
      %61 = arith.cmpi sge, %57, %60 : vector<8x8xi32>
      %62 = vector.shape_cast %61 : vector<8x8xi1> to vector<1x8x8xi1>
      "tpu.trace_start"() <{level = 10 : i32, message = "hqd,hkd->hqk"}> : () -> ()
      %cst_46 = arith.constant dense<0.000000e+00> : vector<4x8x8xf32>
      %63 = tpu.matmul %7, %50, %cst_46 {dimension_numbers = #tpu.dot_dimension_numbers<[2], [2], [1], [1], [0, 0, 0, 1, 1, 1], [0], [0]>} : vector<4x8x8xf32>, vector<4x8x8xf32>, vector<4x8x8xf32> -> vector<4x8x8xf32>
      %cst_47 = arith.constant -8.192000e+03 : f32
      "tpu.trace_stop"() : () -> ()
      %64 = vector.shape_cast %62 : vector<1x8x8xi1> to vector<1x8x8xi1>
      %65 = vector.broadcast %64 : vector<1x8x8xi1> to vector<4x8x8xi1>
      %66 = vector.broadcast %cst_47 : f32 to vector<4x8x8xf32>
      %67 = arith.select %65, %63, %66 : vector<4x8x8xi1>, vector<4x8x8xf32>
      %c0_48 = arith.constant 0 : index
      %c0_49 = arith.constant 0 : index
      %c0_50 = arith.constant 0 : index
      %68 = vector.load %arg8[%c0_48, %c0_49, %c0_50] : memref<4x8x1xf32, #tpu.memory_space<vmem>>, vector<4x8x1xf32>
      %cst_51 = arith.constant dense<0xFF800000> : vector<4x8xf32>
      %69 = vector.multi_reduction <maximumf>, %67, %cst_51 [2] : vector<4x8x8xf32> to vector<4x8xf32>
      %70 = vector.shape_cast %69 : vector<4x8xf32> to vector<4x8x1xf32>
      %71 = arith.maximumf %68, %70 : vector<4x8x1xf32>
      %72 = arith.subf %68, %71 : vector<4x8x1xf32>
      %73 = math.exp %72 : vector<4x8x1xf32>
      %74 = vector.broadcast %71 : vector<4x8x1xf32> to vector<4x8x8xf32>
      %75 = arith.subf %67, %74 : vector<4x8x8xf32>
      %76 = math.exp %75 : vector<4x8x8xf32>
      %c0_52 = arith.constant 0 : index
      %c0_53 = arith.constant 0 : index
      %c0_54 = arith.constant 0 : index
      %77 = vector.load %arg9[%c0_52, %c0_53, %c0_54] : memref<4x8x1xf32, #tpu.memory_space<vmem>>, vector<4x8x1xf32>
      %78 = arith.mulf %73, %77 : vector<4x8x1xf32>
      %cst_55 = arith.constant dense<0.000000e+00> : vector<4x8xf32>
      %79 = vector.multi_reduction <add>, %76, %cst_55 [2] : vector<4x8x8xf32> to vector<4x8xf32>
      %80 = vector.shape_cast %79 : vector<4x8xf32> to vector<4x8x1xf32>
      %81 = arith.addf %78, %80 : vector<4x8x1xf32>
      %c0_56 = arith.constant 0 : index
      %c0_57 = arith.constant 0 : index
      %c0_58 = arith.constant 0 : index
      %82 = vector.load %arg9[%c0_56, %c0_57, %c0_58] : memref<4x8x1xf32, #tpu.memory_space<vmem>>, vector<4x8x1xf32>
      tpu.vector_store %arg9[%c0_56, %c0_57, %c0_58], %81 {strides = array<i32>} : memref<4x8x1xf32, #tpu.memory_space<vmem>>, vector<4x8x1xf32>,
      %c0_59 = arith.constant 0 : index
      %c0_60 = arith.constant 0 : index
      %c0_61 = arith.constant 0 : index
      %83 = vector.load %arg10[%c0_59, %c0_60, %c0_61] : memref<4x8x8xf32, #tpu.memory_space<vmem>>, vector<4x8x8xf32>
      %84 = vector.broadcast %73 : vector<4x8x1xf32> to vector<4x8x8xf32>
      %85 = arith.mulf %84, %83 : vector<4x8x8xf32>
      "tpu.trace_start"() <{level = 10 : i32, message = "hqk,hkd->hqd"}> : () -> ()
      %cst_62 = arith.constant dense<0.000000e+00> : vector<4x8x8xf32>
      %86 = tpu.matmul %76, %53, %cst_62 {dimension_numbers = #tpu.dot_dimension_numbers<[2], [1], [1], [2], [0, 0, 0, 1, 1, 2], [0], [0]>} : vector<4x8x8xf32>, vector<4x8x8xf32>, vector<4x8x8xf32> -> vector<4x8x8xf32>
      "tpu.trace_stop"() : () -> ()
      %87 = arith.addf %85, %86 : vector<4x8x8xf32>
      %c0_63 = arith.constant 0 : index
      %c0_64 = arith.constant 0 : index
      %c0_65 = arith.constant 0 : index
      %88 = vector.load %arg10[%c0_63, %c0_64, %c0_65] : memref<4x8x8xf32, #tpu.memory_space<vmem>>, vector<4x8x8xf32>
      tpu.vector_store %arg10[%c0_63, %c0_64, %c0_65], %87 {strides = array<i32>} : memref<4x8x8xf32, #tpu.memory_space<vmem>>, vector<4x8x8xf32>,
      %c0_66 = arith.constant 0 : index
      %c0_67 = arith.constant 0 : index
      %c0_68 = arith.constant 0 : index
      %89 = vector.load %arg8[%c0_66, %c0_67, %c0_68] : memref<4x8x1xf32, #tpu.memory_space<vmem>>, vector<4x8x1xf32>
      tpu.vector_store %arg8[%c0_66, %c0_67, %c0_68], %71 {strides = array<i32>} : memref<4x8x1xf32, #tpu.memory_space<vmem>>, vector<4x8x1xf32>,
    }
    %c0_17 = arith.constant 0 : index
    %c0_18 = arith.constant 0 : index
    %c0_19 = arith.constant 0 : index
    %14 = vector.load %arg10[%c0_17, %c0_18, %c0_19] : memref<4x8x8xf32, #tpu.memory_space<vmem>>, vector<4x8x8xf32>
    %c0_20 = arith.constant 0 : index
    %c0_21 = arith.constant 0 : index
    %c0_22 = arith.constant 0 : index
    %15 = vector.load %arg9[%c0_20, %c0_21, %c0_22] : memref<4x8x1xf32, #tpu.memory_space<vmem>>, vector<4x8x1xf32>
    %16 = tpu.reciprocal %15 {approx = true} : vector<4x8x1xf32> -> vector<4x8x1xf32>
    %17 = vector.broadcast %16 : vector<4x8x1xf32> to vector<4x8x8xf32>
    %18 = arith.mulf %14, %17 : vector<4x8x8xf32>
    %cst_23 = arith.constant 0.000000e+00 : f32
    %19 = vector.broadcast %cst_23 : f32 to vector<8x32xf32>
    %20 = vector.extract_strided_slice %18 {offsets = [0, 0, 0], sizes = [1, 8, 8], strides = [1, 1, 1]} : vector<4x8x8xf32> to vector<1x8x8xf32>
    %21 = vector.shape_cast %20 : vector<1x8x8xf32> to vector<8x8xf32>
    %c0_24 = arith.constant 0 : index
    %c0_25 = arith.constant 0 : index
    %22 = vector.load %arg5[%c0_24, %c0_25] : memref<32x32xf32, #tpu.memory_space<vmem>>, vector<8x32xf32>
    %cst_26 = arith.constant dense<0.000000e+00> : vector<8x32xf32>
    %23 = tpu.matmul %21, %22, %cst_26 {dimension_numbers = #tpu.dot_dimension_numbers<[1], [0], [0], [1], [0, 0, 1, 1], [], []>} : vector<8x8xf32>, vector<8x32xf32>, vector<8x32xf32> -> vector<8x32xf32>
    %24 = arith.addf %19, %23 : vector<8x32xf32>
    %25 = vector.extract_strided_slice %18 {offsets = [1, 0, 0], sizes = [1, 8, 8], strides = [1, 1, 1]} : vector<4x8x8xf32> to vector<1x8x8xf32>
    %26 = vector.shape_cast %25 : vector<1x8x8xf32> to vector<8x8xf32>
    %c8 = arith.constant 8 : index
    %c0_27 = arith.constant 0 : index
    %27 = vector.load %arg5[%c8, %c0_27] : memref<32x32xf32, #tpu.memory_space<vmem>>, vector<8x32xf32>
    %cst_28 = arith.constant dense<0.000000e+00> : vector<8x32xf32>
    %28 = tpu.matmul %26, %27, %cst_28 {dimension_numbers = #tpu.dot_dimension_numbers<[1], [0], [0], [1], [0, 0, 1, 1], [], []>} : vector<8x8xf32>, vector<8x32xf32>, vector<8x32xf32> -> vector<8x32xf32>
    %29 = arith.addf %24, %28 : vector<8x32xf32>
    %30 = vector.extract_strided_slice %18 {offsets = [2, 0, 0], sizes = [1, 8, 8], strides = [1, 1, 1]} : vector<4x8x8xf32> to vector<1x8x8xf32>
    %31 = vector.shape_cast %30 : vector<1x8x8xf32> to vector<8x8xf32>
    %c16 = arith.constant 16 : index
    %c0_29 = arith.constant 0 : index
    %32 = vector.load %arg5[%c16, %c0_29] : memref<32x32xf32, #tpu.memory_space<vmem>>, vector<8x32xf32>
    %cst_30 = arith.constant dense<0.000000e+00> : vector<8x32xf32>
    %33 = tpu.matmul %31, %32, %cst_30 {dimension_numbers = #tpu.dot_dimension_numbers<[1], [0], [0], [1], [0, 0, 1, 1], [], []>} : vector<8x8xf32>, vector<8x32xf32>, vector<8x32xf32> -> vector<8x32xf32>
    %34 = arith.addf %29, %33 : vector<8x32xf32>
    %35 = vector.extract_strided_slice %18 {offsets = [3, 0, 0], sizes = [1, 8, 8], strides = [1, 1, 1]} : vector<4x8x8xf32> to vector<1x8x8xf32>
    %36 = vector.shape_cast %35 : vector<1x8x8xf32> to vector<8x8xf32>
    %c24 = arith.constant 24 : index
    %c0_31 = arith.constant 0 : index
    %37 = vector.load %arg5[%c24, %c0_31] : memref<32x32xf32, #tpu.memory_space<vmem>>, vector<8x32xf32>
    %cst_32 = arith.constant dense<0.000000e+00> : vector<8x32xf32>
    %38 = tpu.matmul %36, %37, %cst_32 {dimension_numbers = #tpu.dot_dimension_numbers<[1], [0], [0], [1], [0, 0, 1, 1], [], []>} : vector<8x8xf32>, vector<8x32xf32>, vector<8x32xf32> -> vector<8x32xf32>
    %39 = arith.addf %34, %38 : vector<8x32xf32>
    %c0_33 = arith.constant 0 : index
    %c0_34 = arith.constant 0 : index
    %40 = vector.load %arg6[%c0_33, %c0_34] : memref<1x32xf32, #tpu.memory_space<vmem>>, vector<1x32xf32>
    %41 = vector.broadcast %40 : vector<1x32xf32> to vector<8x32xf32>
    %42 = arith.addf %39, %41 : vector<8x32xf32>
    %c0_35 = arith.constant 0 : index
    %c0_36 = arith.constant 0 : index
    %c0_37 = arith.constant 0 : index
    %43 = vector.load %arg7[%c0_35, %c0_36, %c0_37] : memref<1x8x32xf32, #tpu.memory_space<vmem>>, vector<1x8x32xf32>
    %44 = vector.shape_cast %43 : vector<1x8x32xf32> to vector<8x32xf32>
    %45 = vector.shape_cast %42 : vector<8x32xf32> to vector<1x8x32xf32>
    tpu.vector_store %arg7[%c0_35, %c0_36, %c0_37], %45 {strides = array<i32>} : memref<1x8x32xf32, #tpu.memory_space<vmem>>, vector<1x8x32xf32>,
    return
  }
  func.func @transform_0(%arg0: i32, %arg1: i32) -> (i32, i32, i32, i32) {
    %c0_i32 = arith.constant 0 : i32
    %c0_i32_0 = arith.constant 0 : i32
    %c0_i32_1 = arith.constant 0 : i32
    return %arg0, %c0_i32, %arg1, %c0_i32_0 : i32, i32, i32, i32
  }
  func.func @transform_1(%arg0: i32, %arg1: i32) -> (i32, i32, i32, i32) {
    %c0_i32 = arith.constant 0 : i32
    %c0_i32_0 = arith.constant 0 : i32
    %c0_i32_1 = arith.constant 0 : i32
    %c0_i32_2 = arith.constant 0 : i32
    return %arg0, %c0_i32, %c0_i32_0, %c0_i32_1 : i32, i32, i32, i32
  }
  func.func @transform_2(%arg0: i32, %arg1: i32) -> (i32, i32, i32, i32) {
    %c0_i32 = arith.constant 0 : i32
    %c0_i32_0 = arith.constant 0 : i32
    %c0_i32_1 = arith.constant 0 : i32
    %c0_i32_2 = arith.constant 0 : i32
    return %arg0, %c0_i32, %c0_i32_0, %c0_i32_1 : i32, i32, i32, i32
  }
  func.func @transform_3(%arg0: i32, %arg1: i32) -> (i32, i32) {
    %c0_i32 = arith.constant 0 : i32
    %c0_i32_0 = arith.constant 0 : i32
    %c0_i32_1 = arith.constant 0 : i32
    return %c0_i32, %c0_i32_0 : i32, i32
  }
  func.func @transform_4(%arg0: i32, %arg1: i32) -> (i32, i32) {
    %c0_i32 = arith.constant 0 : i32
    %c0_i32_0 = arith.constant 0 : i32
    %c0_i32_1 = arith.constant 0 : i32
    return %c0_i32, %c0_i32_0 : i32, i32
  }
  func.func @transform_5(%arg0: i32, %arg1: i32) -> (i32, i32, i32) {
    %c0_i32 = arith.constant 0 : i32
    %c0_i32_0 = arith.constant 0 : i32
    return %arg0, %arg1, %c0_i32 : i32, i32, i32
  }
}

</mosaic_0001>

<bundles_post_ra>
// kernel: tpu_custom_call.1
= control target key start
LH: loop header
LB: loop body
LE: loop exit
PB: predicated region body
PF: predicated region fallthrough
CT: control target
= control target key end

     0   :  { %s1787_s0 = inlined_call_operand.hbm [shape: f32[2,4,8,8], index: 0, kind: input, shape index: {}]   ;;  %s1788_s1 = inlined_call_operand.hbm [shape: f32[2,4,8,8], index: 1, kind: input, shape index: {}]   ;;  %s1789_s2 = inlined_call_operand.hbm [shape: f32[2,4,8,8], index: 2, kind: input, shape index: {}]   ;;  %s1790_s3 = inlined_call_operand.hbm [shape: f32[32,32], index: 3, kind: input, shape index: {}]   ;;  %s1791_s4 = inlined_call_operand.vmem [shape: f32[1,32], index: 4, kind: input, shape index: {}]   ;;  %s1792_s5 = inlined_call_operand.hbm [shape: f32[2,8,32], index: 5, kind: output, shape index: {}]  }
   0x1   :  { %1800 = sst [smem:[#allocation21_spill]] %s1787_s0 }
   0x2   :  { %1801 = sst [smem:[#allocation22_spill]] %s1788_s1 }
   0x3   :  { %1802 = sst [smem:[#allocation23_spill]] %s1790_s3 }
   0x4   :  { %10 = vsyncpa [#allocation6], 0 }
   0x5   :  { %12 = vsyncpa [#allocation6 + $0x1], 0 }
   0x6   :  { %13 = vsyncpa [#allocation9], 0 }
   0x7   :  { %15 = vsyncpa [#allocation9 + $0x1], 0 }
   0x8   :  { %16 = vsyncpa [#allocation12], 0 }
   0x9   :  { %17 = vsyncpa [#allocation7], 0 }
   0xa   :  { %19 = vsyncpa [#allocation7 + $0x1], 0  ;;  %s1477_s18 = smov 0   ;;  %s1479_s19 = smov 0  }
   0xb   :  { %s1481_s20 = smov 0   ;;  %s1483_s21 = smov 0  }
   0xc   :  { %s1485_s22 = smov 0   ;;  %s1487_s23 = smov 0  }
   0xd LB: > { %1803 = sst [smem:[#allocation18_spill]] %s1430_s22  ;;  %s37_s24 = sadd.s32 1, %s1430_s22  ;;  %s1434_s23 = sphi %s1487_s23, %s25_s23   ;;  %s1430_s22 = sphi %s1485_s22, %s1819_s22   ;;  %s1426_s21 = sphi %s1483_s21, %s1818_s21   ;;  %s1422_s20 = sphi %s1481_s20, %s1822_s20   ;;  %s1418_s19 = sphi %s1479_s19, %s1821_s19   ;;  %s1414_s18 = sphi %s1477_s18, %s1820_s18  }
   0xe   : > { %s46_s25 = sadd.s32 1, %s1422_s20  ;;  %p39_p0 = scmp.ge.s32.totalorder %s37_s24, 2 }
   0xf   : > { %p53_p1 = scmp.ne.s32.totalorder %s1422_s20, %s1418_s19  ;;  %p54_p2 = scmp.eq.s32.totalorder %s1434_s23, 0 }
  0x10   : > { %s1824_s24 = smov (%p39_p0, %s37_s24), 0  ;;  %p1053_p4 = scmp.ge.s32.totalorder %s1434_s23, 2 }
  0x11   : > { %1804 = sst [smem:[#allocation19_spill]] %s1824_s24  ;;  %p55_p3 = por %p54_p2, %p53_p1 }
  0x12   : > { %s41_s26 = ssub.s32 %s1430_s22, %s1824_s24  ;;  %p1124_p6 = scmp.lt.s32.totalorder %s1434_s23, 2 }
  0x13   : > { %p44_p5 = scmp.eq.s32.totalorder %s41_s26, 0  ;;  %s1793_s27 = sand.u32 1, %s1422_s20  }
  0x14   : > { %s1523_s28 = sshll.u32 %s1430_s22, 5  ;;  %s1530_s30 = sshll.u32 %s1793_s27, 5 }
  0x15   : > { %s1526_s29 = scalar_select %p44_p5, %s1422_s20, %s46_s25  }
  0x16   : > { %p1532_p7 = pnand %p1124_p6, %p55_p3  ;;  %s245_s7 = sand.u32 1, %s1434_s23  }
  0x17   : > { %1805 = sst [smem:[#allocation20_spill]] %s1526_s29  ;;  %s249_s11 = scalar_lea.vmem [#allocation8], %s1530_s30 }
  0x18   : > { %s1807_s1 = sld [smem:[#allocation22_spill]]  ;;  %s257_s12 = sshll.u32 %s249_s11, 4  ;;  %s258_s12 = int_to_ptr.vmem [resolvable:$true] %s257_s12 }
  0x19   : > { %s1542_s14 = scalar_lea.sflag [#allocation9], %s245_s7  ;;  %s1794_s15 = smov 128  }
  0x1a   : > { %s1796_s16 = smov 8   ;;  %s1551_s17 = sadd.s32 4294967295, %s1434_s23  }
  0x1b   : > { %s1050_s25 = sadd.s32 4294967294, %s1434_s23   ;;  %p59_p8 = scmp.ne.s32.totalorder %s1418_s19, %s1414_s18 }
  0x1c   : > { %p60_p9 = scmp.eq.s32.totalorder %s1551_s17, 0  ;;  %p179_p10 = scmp.eq.s32.totalorder %s1551_s17, 1 }
  0x1d   : > { %p185_p11 = scmp.eq.s32.totalorder %s1050_s25, 1  ;;  %p1051_p12 = scmp.ge.s32.totalorder %s1434_s23, 1 }
  0x1e   : > { %s254_s10 = scalar_lea.hbm %s1807_s1, %s1523_s28  ;;  %p1561_p13 = por %p60_p9, %p59_p8 }
  0x1f   : > { %s255_s13 = sshll.u32 %s254_s10, 4  ;;  %p1568_p0 = por %p179_p10, %p53_p1  ;;  %s256_s13 = int_to_ptr.hbm [resolvable:$true] %s255_s13 }
  0x20   : > { %1115 = dma.hbm_to_vmem [thread:$0]  (!%p1532_p7), %s256_s13, 512, %s258_s12, %s1542_s14, %s1794_s15, %s1794_s15, %s1796_s16  }
  0x21   : > { %p1572_p2 = por %p185_p11, %p59_p8  ;;  %p192_p3 = scmp.lt.s32.totalorder %s1434_s23, 3 }
  0x22   : > { %s1811_s3 = sld [smem:[#allocation23_spill]]  ;;  %s1442_s13 = smov [#allocation11]  }
  0x23   : > { %p1580_p5 = pnand %p1051_p12, %p192_p3  ;;  %s205_s25 = sshll.u32 %s1442_s13, 4  ;;  %s206_s25 = int_to_ptr.vmem [resolvable:$true] %s205_s25 }
  0x24   : > { %s1813_s0 = sld [smem:[#allocation21_spill]]  ;;  %s226_s16 = scalar_lea.vmem [#allocation5], %s1530_s30 }
  0x25   : > { %p1105_p1 = pneg %p1580_p5  ;;  %s235_s1 = sshll.u32 %s226_s16, 4  ;;  %s236_s1 = int_to_ptr.vmem [resolvable:$true] %s235_s1 }
  0x26   : > { %s1815_s24 = smov 128   ;;  %s1816_s22 = sand.u32 1, %s1422_s20  }
  0x27   : > { %p1106_p6 = pnand %p1105_p1, %p60_p9  ;;  %s223_s13 = scalar_lea.sflag [#allocation6], %s1816_s22 }
  0x28   : > { %s203_s11 = sshll.u32 %s1811_s3, 4  ;;  %s1814_s3 = smov 8   ;;  %s204_s11 = int_to_ptr.hbm [resolvable:$true] %s203_s11 }
  0x29   : > { %1108 = dma.hbm_to_vmem [thread:$0]  (!%p1106_p6), %s204_s11, 512, %s206_s25, [#allocation12], %s1815_s24, %s1815_s24, %s1814_s3  }
  0x2a   : > { %s232_s10 = scalar_lea.hbm %s1813_s0, %s1523_s28  ;;  %s276_s0 = scalar_lea.hbm %s1789_s2, %s1523_s28 }
  0x2b   : > { %s233_s15 = sshll.u32 %s232_s10, 4  ;;  %s271_s10 = scalar_lea.vmem [#allocation10], %s1530_s30  ;;  %s234_s15 = int_to_ptr.hbm [resolvable:$true] %s233_s15 }
  0x2c   : > { %1112 = dma.hbm_to_vmem [thread:$0]  (!%p1532_p7), %s234_s15, 512, %s236_s1, %s223_s13, %s1815_s24, %s1815_s24, %s1814_s3  }
  0x2d   : > { %s279_s29 = sshll.u32 %s271_s10, 4  ;;  %s277_s16 = sshll.u32 %s276_s0, 4  ;;  %s280_s29 = int_to_ptr.vmem [resolvable:$true] %s279_s29  ;;  %s278_s16 = int_to_ptr.hbm [resolvable:$true] %s277_s16 }
  0x2e   : > { %1118 = dma.hbm_to_vmem [thread:$0]  (!%p1532_p7), %s278_s16, 512, %s280_s29, %s1542_s14, %s1815_s24, %s1815_s24, %s1814_s3  }
  0x2f   : > { %291 = sbr.rel (%p1580_p5) target bundleno = 845 (0x34d), region = 40  ;;  %s1617_s1 = sand.u32 (!%p1580_p5), 1, %s1418_s19  }
  0x30   : > { %s1620_s22 = sshll.u32 (!%p1580_p5), %s1617_s1, 5  ;;  %s294_s0 = scalar_lea.sflag (!%p1580_p5), [#allocation6], %s1617_s1 }
  0x31   : > { %s297_s28 = scalar_lea.vmem (!%p1580_p5), [#allocation5], %s1620_s22 }
  0x34   : > { %1397 = dma.done.wait (%p1561_p13), %s294_s0, 512  }
  0x35   : > { %1399 = vsyncadd (%p1561_p13), %s294_s0, 4294966784  ;;  %s303_s3 = sand.u32 1, %s1551_s17   ;;  %s307_s29 = scalar_lea.vmem [#allocation8], %s1620_s22 }
  0x36   : > { %s304_s24 = scalar_lea.sflag [#allocation9], %s303_s3 }
  0x37   : > { %1401 = dma.done.wait (%p1561_p13), %s304_s24, 1024  }
  0x38   : > { %1403 = vsyncadd (%p1561_p13), %s304_s24, 4294966272  ;;  %s317_s30 = scalar_lea.vmem [#allocation10], %s1620_s22 }
  0x39   : > { %1405 = dma.done.wait (%p60_p9), [#allocation12], 512  }
  0x3a   : > { %1407 = vsyncadd (%p60_p9), [#allocation12], 4294966784  ;;  %s1068_s6 = sshll.u32 %s1617_s1, 3  ;;  %vm360_vm0 = vcmask 7168   ;;  %v1443_v0 = vmov -inf   ;;  %v1444_v1 = vmov 0.0  }
  0x3b   : > { %361 = vst.msk [vmem:[#allocation2] sm:$0xff] %vm360_vm0, %v1443_v0  ;;  %vm369_vm1 = vcmask 64512   ;;  %v1646_v2 = vld [vmem:[%s297_s28] sm:$0xff]  ;;  %v1648_v3 = vld [vmem:[%s297_s28 + $0x8] sm:$0xff]  ;;  %v1650_v4 = vld [vmem:[%s297_s28 + $0x10] sm:$0xff]  ;;  %s1660_s14 = scalar_lea.vmem [#allocation13], %s1068_s6 }
  0x3c   : > { %362 = vst.msk [vmem:[#allocation2 + $0x8] sm:$0xff] %vm360_vm0, %v1443_v0  ;;  %v1653_v5 = vld [vmem:[%s297_s28 + $0x18] sm:$0xff]  ;;  %s1662_s15 = smov 0  }
  0x3d   : > { %363 = vst.msk [vmem:[#allocation2 + $0x10] sm:$0xff] %vm360_vm0, %v1443_v0 }
  0x3e   : > { %364 = vst.msk [vmem:[#allocation2 + $0x18] sm:$0xff] %vm360_vm0, %v1443_v0 }
  0x3f   : > { %365 = vst.msk [vmem:[#allocation3] sm:$0xff] %vm360_vm0, %v1444_v1 }
  0x40   : > { %366 = vst.msk [vmem:[#allocation3 + $0x8] sm:$0xff] %vm360_vm0, %v1444_v1 }
  0x41   : > { %367 = vst.msk [vmem:[#allocation3 + $0x10] sm:$0xff] %vm360_vm0, %v1444_v1 }
  0x42   : > { %368 = vst.msk [vmem:[#allocation3 + $0x18] sm:$0xff] %vm360_vm0, %v1444_v1 }
  0x43   : > { %370 = vst.msk [vmem:[#allocation4] sm:$0xff] %vm369_vm1, %v1444_v1 }
  0x44   : > { %371 = vst.msk [vmem:[#allocation4 + $0x8] sm:$0xff] %vm369_vm1, %v1444_v1 }
  0x45   : > { %372 = vst.msk [vmem:[#allocation4 + $0x10] sm:$0xff] %vm369_vm1, %v1444_v1 }
  0x46   : > { %373 = vst.msk [vmem:[#allocation4 + $0x18] sm:$0xff] %vm369_vm1, %v1444_v1 }
  0x47 LB: >> { %s1668_s17 = sshll.u32 %s1438_s15, 3  ;;  %v404_v10 = vlaneseq  ;;  %v1445_v27 = vmov 0   ;;  %v524_v28 = vld [vmem:[#allocation2] sm:$0xff]  ;;  %v526_v32 = vld [vmem:[#allocation2 + $0x10] sm:$0xff]  ;;  %v525_v34 = vld [vmem:[#allocation2 + $0x8] sm:$0xff]  ;;  %s390_s15 = sadd.s32 1, %s1438_s15   ;;  %s1438_s15 = sphi %s1662_s15, %s390_s15  }
  0x48   : >> { %s394_s26 = scalar_lea.vmem %s307_s29, %s1668_s17 [#allocation8]  ;;  %v411_v12 = vstv %s1668_s17  ;;  %1191 = vset.pattern.permute.xlu0 %v1445_v27  ;;  %1190 = vset.pattern.permute.xlu2 %v1445_v27  ;;  %v527_v42 = vld [vmem:[#allocation2 + $0x18] sm:$0xff]  ;;  %s399_s11 = scalar_lea.vmem %s317_s30, %s1668_s17 [#allocation10] }
  0x49   : >> { %v395_v6 = vld [vmem:[%s394_s26] sm:$0xff]  ;;  %v397_v7 = vld [vmem:[%s394_s26 + $0x10] sm:$0xff]  ;;  %v396_v8 = vld [vmem:[%s394_s26 + $0x8] sm:$0xff]  ;;  %v410_v11 = vand.u32 127, %v404_v10  ;;  %v405_v13 = vshrl.u32 %v404_v10, 7  ;;  %1192 = vset.pattern.permute.xlu1 %v1445_v27  ;;  %p389_p7 = scmp.ge.s32.totalorder %s390_s15, 1 }
  0x4a   : >> { %1070 = vmatpush.xpose.msk.msra.mxu0 %vm369_vm1, %v395_v6  ;;  %1074 = vmatpush.xpose.msk.msra.mxu2 %vm369_vm1, %v397_v7  ;;  %v398_v9 = vld [vmem:[%s394_s26 + $0x18] sm:$0xff]  ;;  %v402_v52 = vld [vmem:[%s399_s11 + $0x10] sm:$0xff]  ;;  %v400_v54 = vld [vmem:[%s399_s11] sm:$0xff]  ;;  %s1087_s12 = sshll.u32 (%p389_p7), %s1426_s21, 3  ;;  %s903_s16 = sshll.u32 (%p389_p7), %s1660_s14, 4  ;;  %vm887_vm3 = vcmask (%p389_p7), 261120   ;;  %s904_s16 = int_to_ptr.vmem [resolvable:$true] %s903_s16 }
  0x4b   : >> { %1072 = vmatpush.xpose.msk.msra.mxu1 %vm369_vm1, %v396_v8  ;;  %1076 = vmatpush.xpose.msk.msra.mxu3 %vm369_vm1, %v398_v9  ;;  %v412_v14 = vadd.s32 %v411_v12, %v410_v11  ;;  %v403_v53 = vld [vmem:[%s399_s11 + $0x18] sm:$0xff]  ;;  %v401_v55 = vld [vmem:[%s399_s11 + $0x8] sm:$0xff]  ;;  %s901_s27 = scalar_lea.hbm (%p389_p7), %s1792_s5, %s1087_s12  ;;  %s890_s21 = scalar_lea.sflag (%p389_p7), [#allocation7], %s1617_s1 }
  0x4c   : > { %s905_s22 = sshll.u32 (%p389_p7), %s901_s27, 4  ;;  %s1360_s29 = scalar_lea.hbm (%p389_p7), %s1792_s5, 16  ;;  %s906_s22 = int_to_ptr.hbm [resolvable:$true] %s905_s22 }
  0x4d   : >> { %1071 = vmatmul.msk.f32.vlgmr.msra.gmra.mxu0 %vm369_vm1, %v1646_v2  ;;  %1075 = vmatmul.msk.f32.vlgmr.msra.gmra.mxu2 %vm369_vm1, %v1650_v4  ;;  %vm413_vm2 = vcmp.ge.s32.totalorder %v405_v13, %v412_v14  ;;  %v784_v2 = vld [vmem:[#allocation11] sm:$0xff] (%p389_p7)  ;;  %v857_v4 = vld [vmem:[#allocation11 + $0x18] sm:$0xff] (%p389_p7)  ;;  %s1354_s0 = sshra.s32 (%p389_p7), %s906_s22, 4  ;;  %s1355_s0 = int_to_ptr.hbm [resolvable:$true] %s1354_s0 }
  0x4e   : >> { %1073 = vmatmul.msk.f32.vlgmr.msra.gmra.mxu1 %vm369_vm1, %v1648_v3  ;;  %1077 = vmatmul.msk.f32.vlgmr.msra.gmra.mxu3 %vm369_vm1, %v1653_v5  ;;  %v785_v3 = vld [vmem:[#allocation11 + $0x8] sm:$0xff] (%p389_p7)  ;;  %s1356_s28 = scalar_lea.hbm (%p389_p7), %s1355_s0, 8  ;;  %p1361_p11 = scmp.lt.s32.totalorder (%p389_p7), %s1355_s0, %s1792_s5 }
  0x4f   : >> { %708 = vmatpush.msrb.mxu2 %v402_v52  ;;  %731 = vmatpush.msrb.mxu3 %v403_v53  ;;  %p1357_p8 = scmp.ne.s32.totalorder (%p389_p7), %s1355_s0, %s1356_s28  ;;  %p1362_p12 = scmp.lt.s32.totalorder (%p389_p7), %s1360_s29, %s1356_s28 }
  0x50   : >> { %662 = vmatpush.msrb.mxu0 %v400_v54  ;;  %685 = vmatpush.msrb.mxu1 %v401_v55  ;;  %v1446_v54 = vmov (%p389_p7), 0  }
  0x51   : > { %876 = vmatpush.msra.mxu3 (%p389_p7), %v857_v4  ;;  %p1358_p9 = pnand (%p389_p7), %p1357_p8, %p1568_p0  ;;  %p1363_p13 = por (%p389_p7), %p1362_p12, %p1361_p11 }
  0x52   : > { %827 = vmatpush.msra.mxu1 (%p389_p7), %v784_v2  ;;  %804 = vmatpush.msra.mxu0 (%p389_p7), %v785_v3 }
  0x53   : > { %p1359_p10 = pneg (%p389_p7), %p1358_p9 }
  0x55   : > { %p1364_p3 = pnand (%p389_p7), %p1363_p13, %p1359_p10 }
  0xca   : >> { %v437_v15 = vpop.f32.mrf.mxu0 }
  0xcb   : >> { %v1686_v16 = vsel %vm413_vm2, %v437_v15, -8192.0  ;;  %v463_v18 = vpop.f32.mrf.mxu1 }
  0xcc   : >> { %v528_v17 = vsel %vm369_vm1, %v1686_v16, -inf  ;;  %v1690_v19 = vsel %vm413_vm2, %v463_v18, -8192.0 }
  0xcd   : >> { %529 = vmax.xlane.f32.xlu1 %v528_v17  ;;  %v531_v23 = vsel %vm369_vm1, %v1690_v19, -inf }
  0xd0   : >> { %v489_v20 = vpop.f32.mrf.mxu2 }
  0xd1   : >> { %v1692_v21 = vsel %vm413_vm2, %v489_v20, -8192.0  ;;  %v515_v24 = vpop.f32.mrf.mxu3  ;;  %v590_v20 = vld [vmem:[#allocation3 + $0x10] sm:$0xff] }
  0xd2   : >> { %v534_v22 = vsel %vm369_vm1, %v1692_v21, -inf  ;;  %v1698_v25 = vsel %vm413_vm2, %v515_v24, -8192.0  ;;  %v591_v24 = vld [vmem:[#allocation3 + $0x18] sm:$0xff] }
  0xd3   : >> { %535 = vmax.xlane.f32.xlu0 %v534_v22  ;;  %v537_v26 = vsel %vm369_vm1, %v1698_v25, -inf }
  0xd5   : >> { %532 = vmax.xlane.f32.xlu1 %v531_v23 }
  0xdb   : >> { %538 = vmax.xlane.f32.xlu0 %v537_v26 }
 0x140   : >> { %v530_v29 = vpop.xlane.xlu1 %529 }
 0x141   : >> { %v540_v30 = vmax.f32 %v524_v28, %v530_v29 }
 0x143   : >> { %744 = vst.msk [vmem:[#allocation2] sm:$0xff] %vm360_vm0, %v540_v30  ;;  %558 = vperm.xlu0 %1191, %v540_v30   ;;  %v544_v31 = vsub.f32 %v524_v28, %v540_v30  ;;  %v618_v28 = vld [vmem:[#allocation4 + $0x10] sm:$0xff]  ;;  %v588_v30 = vld [vmem:[#allocation3] sm:$0xff] }
 0x145   : >> { %v548_v36 = vmul.f32 1.442695, %v544_v31 }
 0x146   : >> { %v536_v33 = vpop.xlane.xlu0 %535 }
 0x147   : >> { %v542_v35 = vmax.f32 %v526_v32, %v536_v33  ;;  %1193 = vpow2.f32 %v548_v36 }
 0x148   : >> { %v533_v37 = vpop.xlane.xlu1 %532 }
 0x149   : >> { %v546_v38 = vsub.f32 %v526_v32, %v542_v35  ;;  %746 = vst.msk [vmem:[#allocation2 + $0x10] sm:$0xff] %vm360_vm0, %v542_v35  ;;  %v541_v39 = vmax.f32 %v525_v34, %v533_v37  ;;  %568 = vperm.xlu2 %1190, %v542_v35   ;;  %v619_v35 = vld [vmem:[#allocation4 + $0x18] sm:$0xff] }
 0x14b   : >> { %v552_v40 = vmul.f32 1.442695, %v546_v38  ;;  %745 = vst.msk [vmem:[#allocation2 + $0x8] sm:$0xff] %vm360_vm0, %v541_v39  ;;  %563 = vperm.xlu1 %1192, %v541_v39   ;;  %v545_v41 = vsub.f32 %v525_v34, %v541_v39  ;;  %v589_v38 = vld [vmem:[#allocation3 + $0x8] sm:$0xff]  ;;  %v616_v39 = vld [vmem:[#allocation4] sm:$0xff] }
 0x14d   : >> { %1195 = vpow2.f32 %v552_v40  ;;  %v550_v45 = vmul.f32 1.442695, %v545_v41  ;;  %v1706_v46 = vpop.eup %1193 }
 0x14e   : >> { %v539_v43 = vpop.xlane.xlu0 %538  ;;  %v592_v33 = vmul.f32 %v1706_v46, %v588_v30 }
 0x14f   : >> { %v543_v44 = vmax.f32 %v527_v42, %v539_v43  ;;  %1197 = vpow2.f32 %v550_v45 }
 0x151   : >> { %747 = vst.msk [vmem:[#allocation2 + $0x18] sm:$0xff] %vm360_vm0, %v543_v44  ;;  %573 = vperm.xlu2 %1190, %v543_v44   ;;  %v547_v47 = vsub.f32 %v527_v42, %v543_v44 }
 0x153   : >> { %v1196_v48 = vpop.eup %1195  ;;  %622 = vperm.xlu1 %1192, %v1706_v46   ;;  %v554_v49 = vmul.f32 1.442695, %v547_v47 }
 0x154   : >> { %632 = vperm.xlu0 %1191, %v1196_v48  }
 0x155   : >> { %v1709_v50 = vpop.eup %1197  ;;  %1199 = vpow2.f32 %v554_v49 }
 0x156   : >> { %v593_v42 = vmul.f32 %v1709_v50, %v589_v38 }
 0x15b   : >> { %627 = vperm.xlu1 %1192, %v1709_v50   ;;  %v1200_v51 = vpop.eup %1199 }
 0x15c   : > { %1209 = vset.pattern.permute.xlu0 (%p389_p7), %v1446_v54 }
 0x163   : >> { %637 = vperm.xlu1 %1192, %v1200_v51  }
 0x16b   : > { %1210 = vset.pattern.permute.xlu1 (%p389_p7), %v1446_v54 }
 0x1a3   : >> { %v569_v56 = vpop.permute.xlu2 %568 }
 0x1a4   : >> { %v578_v57 = vsub.f32 %v1692_v21, %v569_v56  ;;  %v594_v21 = vmul.f32 %v1196_v48, %v590_v20  ;;  %v617_v48 = vld [vmem:[#allocation4 + $0x8] sm:$0xff] }
 0x1a6   : >> { %v584_v58 = vmul.f32 1.442695, %v578_v57 }
 0x1a8   : >> { %1201 = vpow2.f32 %v584_v58 }
 0x1ab   : >> { %v574_v59 = vpop.permute.xlu2 %573 }
 0x1ac   : >> { %v579_v60 = vsub.f32 %v1698_v25, %v574_v59  ;;  %v595_v25 = vmul.f32 %v1200_v51, %v591_v24 }
 0x1ae   : >> { %v1202_v61 = vpop.eup %1201  ;;  %v586_v62 = vmul.f32 1.442695, %v579_v60 }
 0x1af   : >> { %1080 = vmatmul.msk.f32.vlgmr.msrb.gmra.mxu2 %vm369_vm1, %v1202_v61  ;;  %v602_v63 = vsel %vm369_vm1, %v1202_v61, 0.0  ;;  %v832_v61 = vld [vmem:[#allocation11 + $0x10] sm:$0xff] (%p389_p7) }
 0x1b0   : >> { %1203 = vpow2.f32 %v586_v62  ;;  %603 = vadd.xlane.f32.xlu0 %v602_v63  ;;  %851 = vmatpush.msra.mxu2 (%p389_p7), %v832_v61 }
 0x1b5   : >> { %v559_v0 = vpop.permute.xlu0 %558 }
 0x1b6   : >> { %v1204_v1 = vpop.eup %1203  ;;  %v576_v6 = vsub.f32 %v1686_v16, %v559_v0 }
 0x1b7   : >> { %1081 = vmatmul.msk.f32.vlgmr.msrb.gmra.mxu3 %vm369_vm1, %v1204_v1  ;;  %v605_v7 = vsel %vm369_vm1, %v1204_v1, 0.0 }
 0x1b8   : >> { %v580_v8 = vmul.f32 1.442695, %v576_v6  ;;  %606 = vadd.xlane.f32.xlu1 %v605_v7 }
 0x1ba   : >> { %1205 = vpow2.f32 %v580_v8 }
 0x1bd   : >> { %v564_v9 = vpop.permute.xlu1 %563 }
 0x1be   : >> { %v577_v10 = vsub.f32 %v1690_v19, %v564_v9 }
 0x1c0   : >> { %v1206_v11 = vpop.eup %1205  ;;  %v582_v12 = vmul.f32 1.442695, %v577_v10 }
 0x1c1   : >> { %1078 = vmatmul.msk.f32.vlgmr.msrb.gmra.mxu0 %vm369_vm1, %v1206_v11  ;;  %v596_v13 = vsel %vm369_vm1, %v1206_v11, 0.0 }
 0x1c2   : >> { %1207 = vpow2.f32 %v582_v12  ;;  %597 = vadd.xlane.f32.xlu2 %v596_v13 }
 0x1c5   : >> { %v623_v16 = vpop.permute.xlu1 %622 }
 0x1c6   : >> { %v633_v18 = vpop.permute.xlu0 %632  ;;  %v640_v43 = vmul.f32 %v623_v16, %v616_v39 }
 0x1c7   : >> { %v642_v29 = vmul.f32 %v633_v18, %v618_v28  ;;  %v1211_v18 = vld [vmem:[%s1791_s4] ss:$0 sm:$0xff] (%p389_p7) }
 0x1c8   : >> { %v1208_v14 = vpop.eup %1207 }
 0x1c9   : >> { %1079 = vmatmul.msk.f32.vlgmr.msrb.gmra.mxu1 %vm369_vm1, %v1208_v14  ;;  %v599_v15 = vsel %vm369_vm1, %v1208_v14, 0.0 }
 0x1ca   : >> { %600 = vadd.xlane.f32.xlu2 %v599_v15 }
 0x1cd   : >> { %v628_v17 = vpop.permute.xlu1 %627 }
 0x1ce   : >> { %v641_v49 = vmul.f32 %v628_v17, %v617_v48 }
 0x1d5   : >> { %v638_v19 = vpop.permute.xlu1 %637 }
 0x1d6   : >> { %v643_v37 = vmul.f32 %v638_v19, %v619_v35 }
 0x223   : >> { %v604_v22 = vpop.xlane.xlu0 %603 }
 0x224   : >> { %v610_v23 = vadd.f32 %v604_v22, %v594_v21 }
 0x226   : >> { %614 = vst.msk [vmem:[#allocation3 + $0x10] sm:$0xff] %vm360_vm0, %v610_v23 }
 0x22b   : >> { %v607_v26 = vpop.xlane.xlu1 %606 }
 0x22c   : >> { %v611_v27 = vadd.f32 %v607_v26, %v595_v25 }
 0x22d   : > { %v754_v50 = vld [vmem:[#allocation3 + $0x10] sm:$0xff] (%p389_p7) }
 0x22e   : >> { %615 = vst.msk [vmem:[#allocation3 + $0x18] sm:$0xff] %vm360_vm0, %v611_v27  ;;  %1212 = vrcp.f32 (%p389_p7), %v754_v50 }
 0x232   : >> { %v710_v31 = vpop.f32.mrf.mxu2 }
 0x233   : >> { %v738_v32 = vadd.f32 %v710_v31, %v642_v29 }
 0x234   : > { %v1213_v57 = vpop.eup (%p389_p7), %1212 }
 0x235   : >> { %742 = vst.msk [vmem:[#allocation4 + $0x10] sm:$0xff] %vm369_vm1, %v738_v32  ;;  %v598_v34 = vpop.xlane.xlu2 %597  ;;  %v755_v55 = vld [vmem:[#allocation3 + $0x18] sm:$0xff] (%p389_p7)  ;;  %772 = vperm.xlu0 (%p389_p7), %1209, %v1213_v57  }
 0x236   : >> { %v608_v36 = vadd.f32 %v598_v34, %v592_v33 }
 0x238   : >> { %612 = vst.msk [vmem:[#allocation3] sm:$0xff] %vm360_vm0, %v608_v36 }
 0x23a   : >> { %v733_v40 = vpop.f32.mrf.mxu3 }
 0x23b   : >> { %v739_v41 = vadd.f32 %v733_v40, %v643_v37 }
 0x23c   : > { %v750_v5 = vld [vmem:[#allocation4 + $0x10] sm:$0xff] (%p389_p7) }
 0x23d   : >> { %743 = vst.msk [vmem:[#allocation4 + $0x18] sm:$0xff] %vm369_vm1, %v739_v41  ;;  %v601_v44 = vpop.xlane.xlu2 %600 }
 0x23e   : >> { %v609_v45 = vadd.f32 %v601_v44, %v593_v42  ;;  %v664_v46 = vpop.f32.mrf.mxu0 }
 0x23f   : >> { %v736_v47 = vadd.f32 %v664_v46, %v640_v43  ;;  %v752_v53 = vld [vmem:[#allocation3] sm:$0xff] (%p389_p7) }
 0x240   : >> { %613 = vst.msk [vmem:[#allocation3 + $0x8] sm:$0xff] %vm360_vm0, %v609_v45  ;;  %1214 = vrcp.f32 (%p389_p7), %v752_v53 }
 0x241   : >> { %740 = vst.msk [vmem:[#allocation4] sm:$0xff] %vm369_vm1, %v736_v47  ;;  %1216 = vrcp.f32 (%p389_p7), %v755_v55 }
 0x244   : > { %v751_v7 = vld [vmem:[#allocation4 + $0x18] sm:$0xff] (%p389_p7) }
 0x245   : > { %392 = sbr.rel (!%p389_p7) target bundleno = 71 (0x47), region = 122 }
 0x246   : >> { %v687_v51 = vpop.f32.mrf.mxu1  ;;  %v1215_v58 = vpop.eup (%p389_p7), %1214 }
 0x247   : >> { %v737_v52 = vadd.f32 %v687_v51, %v641_v49  ;;  %v753_v56 = vld [vmem:[#allocation3 + $0x8] sm:$0xff] (%p389_p7)  ;;  %762 = vperm.xlu1 (%p389_p7), %1210, %v1215_v58   ;;  %v1217_v59 = vpop.eup (%p389_p7), %1216 }
 0x248   : > { %1218 = vrcp.f32 (%p389_p7), %v753_v56  ;;  %777 = vperm.xlu0 (%p389_p7), %1209, %v1217_v59   ;;  %v748_v62 = vld [vmem:[#allocation4] sm:$0xff] (%p389_p7) }
 0x249   : >> { %741 = vst.msk [vmem:[#allocation4 + $0x8] sm:$0xff] %vm369_vm1, %v737_v52 }
 0x24e   : > { %v1219_v60 = vpop.eup %1218 }
 0x24f   : > { %767 = vperm.xlu1 %1210, %v1219_v60  }
 0x250   : > { %v749_v8 = vld [vmem:[#allocation4 + $0x8] sm:$0xff] }
 0x2a7   : > { %v773_v63 = vpop.permute.xlu0 %772 }
 0x2a8   : > { %v782_v0 = vmul.f32 %v773_v63, %v750_v5 }
 0x2aa   : > { %1084 = vmatmul.msk.f32.vlgmr.msra.gmra.mxu2 %vm369_vm1, %v782_v0 }
 0x2b9   : > { %v763_v1 = vpop.permute.xlu1 %762 }
 0x2ba   : > { %v780_v6 = vmul.f32 %v763_v1, %v748_v62  ;;  %v778_v9 = vpop.permute.xlu0 %777 }
 0x2bb   : > { %v783_v10 = vmul.f32 %v778_v9, %v751_v7 }
 0x2bc   : > { %1083 = vmatmul.msk.f32.vlgmr.msra.gmra.mxu1 %vm369_vm1, %v780_v6 }
 0x2bd   : > { %1085 = vmatmul.msk.f32.vlgmr.msra.gmra.mxu3 %vm369_vm1, %v783_v10 }
 0x2c1   : > { %v768_v11 = vpop.permute.xlu1 %767 }
 0x2c2   : > { %v781_v12 = vmul.f32 %v768_v11, %v749_v8 }
 0x2c4   : > { %1082 = vmatmul.msk.f32.vlgmr.msra.gmra.mxu0 %vm369_vm1, %v781_v12 }
 0x32d   : > { %v853_v16 = vpop.f32.mrf.mxu2 }
 0x339   : > { %v829_v13 = vpop.f32.mrf.mxu1 }
 0x340   : > { %v878_v20 = vpop.f32.mrf.mxu3 }
 0x341   : > { %v806_v14 = vpop.f32.mrf.mxu0 }
 0x342   : > { %v830_v15 = vadd.f32 %v829_v13, %v806_v14 }
 0x344   : > { %v856_v17 = vadd.f32 %v853_v16, %v830_v15 }
 0x346   : > { %v881_v21 = vadd.f32 %v878_v20, %v856_v17 }
 0x348   : > { %v886_v19 = vadd.f32 %v1211_v18, %v881_v21 }
 0x34a   : > { %888 = vst.msk [vmem:[%s1660_s14] sm:$0xff] %vm887_vm3, %v886_v19 }
 0x34b   : > { %1367 = shalt.err (!%p1364_p3)
}
 0x34c   : > { %1103 = dma.vmem_to_hbm [thread:$0]  (%p1568_p0), %s904_s16, 128, %s906_s22, %s890_s21  }
 0x34d PF: > { %s917_s1 = sand.u32 1, %s1414_s18   ;;  %p1120_p5 = pnand %p1053_p4, %p1572_p2 }
 0x34e   : > { %s918_s14 = scalar_lea.sflag [#allocation7], %s917_s1 }
 0x34f   : > { %p1121_p1 = pneg %p1120_p5 }
 0x351   : > { %1409 = dma.done.wait (%p1121_p1), %s918_s14, 128  }
 0x352   : > { %1411 = vsyncadd (%p1121_p1), %s918_s14, 4294967168  ;;  %s25_s23 = sadd.s32 1, %s1434_s23   ;;  %s1817_s15 = sld [smem:[#allocation20_spill]] }
 0x353   : > { %p22_p6 = scmp.ge.s32.totalorder %s25_s23, 4   ;;  %s1818_s21 = sld [smem:[#allocation18_spill]] }
 0x354   : > { %s1819_s22 = sld [smem:[#allocation19_spill]]  ;;  %s1820_s18 = smov %s1418_s19 }
 0x355   : > { %s1821_s19 = smov %s1422_s20  ;;  %24 = sbr.rel (!%p22_p6) target bundleno = 13 (0xd), region = 133 }
 0x358   : > { %s1822_s20 = smov %s1817_s15 }
 0x35a   :  { %924 = vsyncpa [#allocation6], 1 }
 0x35b   :  { %926 = vsyncpa [#allocation6 + $0x1], 1 }
 0x35c   :  { %927 = vsyncpa [#allocation9], 1 }
 0x35d   :  { %929 = vsyncpa [#allocation9 + $0x1], 1 }
 0x35e   :  { %930 = vsyncpa [#allocation12], 1 }
 0x35f   :  { %931 = vsyncpa [#allocation7], 1 }
 0x360   :  { %933 = vsyncpa [#allocation7 + $0x1], 1 }

</bundles_post_ra>
